<compile_context>
chip_gen: v5e
topology: v5e:2x2
jax: 0.10.0
libtpu: 0.0.40
codegen_flags: <defaults>
</compile_context>

<pallas_src>
import functools
import math

import numpy as np

import jax
import jax.numpy as jnp
from jax import lax
from jax.experimental import pallas as pl
from jax.experimental.pallas import tpu as pltpu


# ----------------------------------------------------------------------------
# Positional encoding (identical to PositionalEncoding.extend_pe, reverse=False)
# ----------------------------------------------------------------------------
@functools.lru_cache(maxsize=None)
def _positional_encoding_np(length, d_model):
    position = np.arange(length, dtype=np.float32)[:, None]
    div_term = np.exp(
        np.arange(0, d_model, 2, dtype=np.float32) * (-math.log(10000.0) / d_model)
    )
    pe = np.zeros((length, d_model), np.float32)
    pe[:, 0::2] = np.sin(position * div_term)
    pe[:, 1::2] = np.cos(position * div_term)
    return pe


def _round_up(n, m):
    return ((n + m - 1) // m) * m


def _pick_batch_block(B, T, max_block=8):
    """Batch elements per grid step: ~512 time rows/step, capped (static unroll),
    keeping >=2 grid steps when possible (megacore)."""
    target = max(1, min(max_block, 512 // max(T, 1)))
    divisors = [d for d in range(1, B + 1) if B % d == 0]
    bblk = max([d for d in divisors if d <= target] or [1])
    if B // bblk < 2:
        smaller = [d for d in divisors if B // d >= 2 and d <= target]
        if smaller:
            bblk = max(smaller)
    return bblk


# ----------------------------------------------------------------------------
# Kernel
# ----------------------------------------------------------------------------
def _make_kernel(xscale, t1, t2):
    def kernel(x_ref, w1_ref, b1_ref, w2_ref, b2_ref, wl_ref, bl_ref, pe_ref,
               out_ref, h1_ref):
        bblk = x_ref.shape[0]

        # Hoist parameter loads out of the (statically unrolled) batch loop.
        w1 = w1_ref[...]
        b1 = b1_ref[...]
        w2 = w2_ref[...]
        b2 = b2_ref[...]
        wl = wl_ref[...]
        bl = bl_ref[...]
        pe = pe_ref[...]

        for b in range(bblk):  # static unroll over the batch block
            # --- Conv1d(idim, odim, k=3, s=1): fused im2col -> one MXU matmul
            x = x_ref[b]                                        # (T, idim_p) bf16
            patch1 = jnp.concatenate(
                [x[0:t1, :], x[1:t1 + 1, :], x[2:t1 + 2, :]], axis=1
            )                                                   # (T1, 3*idim_p)
            acc1 = jnp.dot(patch1, w1, preferred_element_type=jnp.float32)
            h1 = jnp.maximum(acc1 + b1, 0.0)                    # ReLU, f32
            h1_ref[pl.ds(0, t1), :] = h1                        # stage in VMEM scratch

            # --- Conv1d(odim, odim, k=5, s=3): im2col via stride-3 sublane reads
            taps = [h1_ref[pl.ds(k, t2, stride=3), :] for k in range(5)]
            patch2 = jnp.concatenate(taps, axis=1).astype(jnp.bfloat16)
            acc2 = jnp.dot(patch2, w2, preferred_element_type=jnp.float32)
            h2 = jnp.maximum(acc2 + b2, 0.0).astype(jnp.bfloat16)

            # --- Linear -> x*sqrt(odim) + positional encoding
            y = jnp.dot(h2, wl, preferred_element_type=jnp.float32) + bl
            out_ref[b] = (y * xscale + pe).astype(out_ref.dtype)

    return kernel


# ----------------------------------------------------------------------------
# Wrapper
# ----------------------------------------------------------------------------
def _fuse_conv_weight(w, cin_p, cout_p):
    """PyTorch (O, I, K) Conv1d weight -> fused im2col (K*cin_p, cout_p) bf16."""
    O, I, K = w.shape
    wt = jnp.transpose(w, (2, 1, 0))                      # (K, I, O)
    wt = jnp.pad(wt, ((0, 0), (0, cin_p - I), (0, cout_p - O)))
    return wt.reshape(K * cin_p, cout_p).astype(jnp.bfloat16)


def conv1d_subsampling3(x, x_mask, w1, b1, w2, b2, wl, bl):
    """Pallas forward of Conv1dSubsampling3 (eval mode).

    x: (B, T, idim) float32, x_mask: (B, 1, T) bool or None.
    Weights in PyTorch layout: w1 (odim, idim, 3), w2 (odim, odim, 5),
    wl (odim, odim), biases (odim,).
    Returns ((B, T2, odim), mask (B, 1, T2)) with T2 = ((T-2) - 5)//3 + 1.
    """
    B, T, idim = x.shape
    odim = w1.shape[0]
    T1 = T - 2                    # conv1: k=3, s=1, valid
    T2 = (T1 - 5) // 3 + 1        # conv2: k=5, s=3, valid
    assert T2 >= 1, "input too short for Conv1dSubsampling3"
    xscale = math.sqrt(odim)

    # Lane-dense padding of the feature dims (multiples of 128).
    idim_p = _round_up(idim, 128)
    odim_p = _round_up(odim, 128)

    # Inputs / parameters in kernel layout.
    x_p = jnp.pad(x.astype(jnp.bfloat16), ((0, 0), (0, 0), (0, idim_p - idim)))
    w1f = _fuse_conv_weight(w1, idim_p, odim_p)           # (3*idim_p, odim_p) bf16
    w2f = _fuse_conv_weight(w2, odim_p, odim_p)           # (5*odim_p, odim_p) bf16
    wlt = jnp.pad(wl.T, ((0, odim_p - odim), (0, odim_p - odim))).astype(jnp.bfloat16)
    b1r = jnp.pad(b1, (0, odim_p - odim)).reshape(1, odim_p).astype(jnp.float32)
    b2r = jnp.pad(b2, (0, odim_p - odim)).reshape(1, odim_p).astype(jnp.float32)
    blr = jnp.pad(bl, (0, odim_p - odim)).reshape(1, odim_p).astype(jnp.float32)

    pe_np = _positional_encoding_np(T2, odim)             # host-cached
    pe_p = jnp.asarray(np.pad(pe_np, ((0, 0), (0, odim_p - odim))), jnp.float32)

    bblk = _pick_batch_block(B, T)
    grid = (B // bblk,)
    T1_pad = _round_up(T1, 8)

    flops = 2 * B * (T1 * (3 * idim_p) * odim_p
                     + T2 * (5 * odim_p) * odim_p
                     + T2 * odim_p * odim_p)
    bytes_accessed = (B * T * idim_p * 2                                 # x (bf16)
                      + (3 * idim_p + 5 * odim_p + odim_p) * odim_p * 2  # weights
                      + 3 * odim_p * 4 + T2 * odim_p * 4                 # biases + pe
                      + B * T2 * odim_p * 4)                             # output (f32)

    out_full = pl.pallas_call(
        _make_kernel(xscale, T1, T2),
        out_shape=jax.ShapeDtypeStruct((B, T2, odim_p), x.dtype),
        grid_spec=pltpu.PrefetchScalarGridSpec(
            num_scalar_prefetch=0,
            grid=grid,
            in_specs=[
                pl.BlockSpec((bblk, T, idim_p), lambda i: (i, 0, 0)),      # x
                pl.BlockSpec((3 * idim_p, odim_p), lambda i: (0, 0)),      # conv1 W
                pl.BlockSpec((1, odim_p), lambda i: (0, 0)),               # conv1 b
                pl.BlockSpec((5 * odim_p, odim_p), lambda i: (0, 0)),      # conv2 W
                pl.BlockSpec((1, odim_p), lambda i: (0, 0)),               # conv2 b
                pl.BlockSpec((odim_p, odim_p), lambda i: (0, 0)),          # linear W^T
                pl.BlockSpec((1, odim_p), lambda i: (0, 0)),               # linear b
                pl.BlockSpec((T2, odim_p), lambda i: (0, 0)),              # pos. enc.
            ],
            out_specs=pl.BlockSpec((bblk, T2, odim_p), lambda i: (i, 0, 0)),
            scratch_shapes=[pltpu.VMEM((T1_pad, odim_p), jnp.float32)],
        ),
        compiler_params=pltpu.CompilerParams(dimension_semantics=("parallel",)),
        cost_estimate=pl.CostEstimate(flops=flops, transcendentals=0,
                                      bytes_accessed=bytes_accessed),
    )(x_p, w1f, b1r, w2f, b2r, wlt, blr, pe_p)

    out = out_full[:, :, :odim]

    if x_mask is None:
        return out, None
    # Mask subsampling exactly as in the PyTorch forward.
    mask = x_mask[:, :, :-2:1][:, :, :-4:3]
    return out, mask


# ----------------------------------------------------------------------------
# Pure-JAX f32 reference (matches the PyTorch module in eval mode)
# ----------------------------------------------------------------------------
def _reference(x, w1, b1, w2, b2, wl, bl):
    odim = w1.shape[0]
    xc = jnp.transpose(x, (0, 2, 1))                      # (B, idim, T)
    h1 = lax.conv_general_dilated(xc, w1, (1,), "VALID",
                                  dimension_numbers=("NCH", "OIH", "NCH"))
    h1 = jax.nn.relu(h1 + b1[None, :, None])
    h2 = lax.conv_general_dilated(h1, w2, (3,), "VALID",
                                  dimension_numbers=("NCH", "OIH", "NCH"))
    h2 = jax.nn.relu(h2 + b2[None, :, None])
    y = jnp.einsum("bct,oc->bto", h2, wl) + bl
    pe = jnp.asarray(_positional_encoding_np(y.shape[1], odim))
    return y * math.sqrt(odim) + pe[None]


if __name__ == "__main__":
    B, T, idim, odim = 2, 16, 8, 16

    key = jax.random.PRNGKey(0)
    kx, k1, k2, k3, k4, k5, k6 = jax.random.split(key, 7)

    x = jax.random.normal(kx, (B, T, idim), jnp.float32)
    x_mask = jnp.ones((B, 1, T), jnp.bool_)

    # Deterministic synthetic parameters (PyTorch layouts).
    w1 = jax.random.normal(k1, (odim, idim, 3), jnp.float32) * 0.2
    b1 = jax.random.normal(k2, (odim,), jnp.float32) * 0.1
    w2 = jax.random.normal(k3, (odim, odim, 5), jnp.float32) * 0.2
    b2 = jax.random.normal(k4, (odim,), jnp.float32) * 0.1
    wl = jax.random.normal(k5, (odim, odim), jnp.float32) * 0.2
    bl = jax.random.normal(k6, (odim,), jnp.float32) * 0.1

    out, out_mask = conv1d_subsampling3(x, x_mask, w1, b1, w2, b2, wl, bl)
    out = jax.block_until_ready(out)
    out_mask = jax.block_until_ready(out_mask)

    ref = _reference(x, w1, b1, w2, b2, wl, bl)
    ref_mask = x_mask[:, :, :-2:1][:, :, :-4:3]
    assert out.shape == ref.shape, (out.shape, ref.shape)
    assert out_mask.shape == ref_mask.shape, (out_mask.shape, ref_mask.shape)
    assert bool(jnp.all(out_mask == ref_mask)), "mask mismatch"
    # bf16 MXU inputs with f32 accumulation -> slightly looser tolerance than f32.
    err = float(jnp.max(jnp.abs(out - ref)))
    assert err < 7.5e-2, f"mismatch vs reference (max err {err})"

    print("KERNEL_OK")
</pallas_src>

<mosaic_0001>
module attributes {stable_mosaic.version = 11 : i64} {
  func.func @kernel(%arg0: i32, %arg1: memref<1x16x128xbf16, #tpu.memory_space<vmem>>, %arg2: memref<384x128xbf16, #tpu.memory_space<vmem>>, %arg3: memref<1x128xf32, #tpu.memory_space<vmem>>, %arg4: memref<640x128xbf16, #tpu.memory_space<vmem>>, %arg5: memref<1x128xf32, #tpu.memory_space<vmem>>, %arg6: memref<128x128xbf16, #tpu.memory_space<vmem>>, %arg7: memref<1x128xf32, #tpu.memory_space<vmem>>, %arg8: memref<4x128xf32, #tpu.memory_space<vmem>>, %arg9: memref<1x4x128xf32, #tpu.memory_space<vmem>>, %arg10: memref<16x128xf32, #tpu.memory_space<vmem>>) attributes {dimension_semantics = [#tpu.dimension_semantics<parallel>], iteration_bounds = array<i64: 2>, scalar_prefetch = 0 : i64, scratch_operands = 1 : i64, tpu.core_type = #tpu.core_type<tc>, window_params = [{transform_indices = @transform_0, window_bounds = array<i64: 1, 16, 128>}, {pipeline_mode = #tpu.pipeline_mode<synchronous>, transform_indices = @transform_1, window_bounds = array<i64: 384, 128>}, {pipeline_mode = #tpu.pipeline_mode<synchronous>, transform_indices = @transform_2, window_bounds = array<i64: 1, 128>}, {pipeline_mode = #tpu.pipeline_mode<synchronous>, transform_indices = @transform_3, window_bounds = array<i64: 640, 128>}, {pipeline_mode = #tpu.pipeline_mode<synchronous>, transform_indices = @transform_4, window_bounds = array<i64: 1, 128>}, {pipeline_mode = #tpu.pipeline_mode<synchronous>, transform_indices = @transform_5, window_bounds = array<i64: 128, 128>}, {pipeline_mode = #tpu.pipeline_mode<synchronous>, transform_indices = @transform_6, window_bounds = array<i64: 1, 128>}, {pipeline_mode = #tpu.pipeline_mode<synchronous>, transform_indices = @transform_7, window_bounds = array<i64: 4, 128>}, {transform_indices = @transform_8, window_bounds = array<i64: 1, 4, 128>}]} {
    %c0 = arith.constant 0 : index
    %c0_0 = arith.constant 0 : index
    %0 = vector.load %arg2[%c0, %c0_0] : memref<384x128xbf16, #tpu.memory_space<vmem>>, vector<384x128xbf16>
    %c0_1 = arith.constant 0 : index
    %c0_2 = arith.constant 0 : index
    %1 = vector.load %arg3[%c0_1, %c0_2] : memref<1x128xf32, #tpu.memory_space<vmem>>, vector<1x128xf32>
    %c0_3 = arith.constant 0 : index
    %c0_4 = arith.constant 0 : index
    %2 = vector.load %arg4[%c0_3, %c0_4] : memref<640x128xbf16, #tpu.memory_space<vmem>>, vector<640x128xbf16>
    %c0_5 = arith.constant 0 : index
    %c0_6 = arith.constant 0 : index
    %3 = vector.load %arg5[%c0_5, %c0_6] : memref<1x128xf32, #tpu.memory_space<vmem>>, vector<1x128xf32>
    %c0_7 = arith.constant 0 : index
    %c0_8 = arith.constant 0 : index
    %4 = vector.load %arg6[%c0_7, %c0_8] : memref<128x128xbf16, #tpu.memory_space<vmem>>, vector<128x128xbf16>
    %c0_9 = arith.constant 0 : index
    %c0_10 = arith.constant 0 : index
    %5 = vector.load %arg7[%c0_9, %c0_10] : memref<1x128xf32, #tpu.memory_space<vmem>>, vector<1x128xf32>
    %c0_11 = arith.constant 0 : index
    %c0_12 = arith.constant 0 : index
    %6 = vector.load %arg8[%c0_11, %c0_12] : memref<4x128xf32, #tpu.memory_space<vmem>>, vector<4x128xf32>
    %c0_13 = arith.constant 0 : index
    %c0_14 = arith.constant 0 : index
    %c0_15 = arith.constant 0 : index
    %7 = vector.load %arg1[%c0_13, %c0_14, %c0_15] : memref<1x16x128xbf16, #tpu.memory_space<vmem>>, vector<1x16x128xbf16>
    %8 = vector.shape_cast %7 : vector<1x16x128xbf16> to vector<16x128xbf16>
    %9 = vector.extract_strided_slice %8 {offsets = [0, 0], sizes = [14, 128], strides = [1, 1]} : vector<16x128xbf16> to vector<14x128xbf16>
    %10 = vector.extract_strided_slice %8 {offsets = [1, 0], sizes = [14, 128], strides = [1, 1]} : vector<16x128xbf16> to vector<14x128xbf16>
    %11 = vector.extract_strided_slice %8 {offsets = [2, 0], sizes = [14, 128], strides = [1, 1]} : vector<16x128xbf16> to vector<14x128xbf16>
    %12 = tpu.concatenate %9, %10, %11 in 1 : vector<14x128xbf16>, vector<14x128xbf16>, vector<14x128xbf16> -> vector<14x384xbf16>
    %cst = arith.constant dense<0.000000e+00> : vector<14x128xf32>
    %13 = tpu.matmul %12, %0, %cst {dimension_numbers = #tpu.dot_dimension_numbers<[1], [0], [0], [1], [0, 0, 1, 1], [], []>} : vector<14x384xbf16>, vector<384x128xbf16>, vector<14x128xf32> -> vector<14x128xf32>
    %14 = vector.broadcast %1 : vector<1x128xf32> to vector<14x128xf32>
    %15 = arith.addf %13, %14 : vector<14x128xf32>
    %cst_16 = arith.constant 0.000000e+00 : f32
    %16 = vector.broadcast %cst_16 : f32 to vector<14x128xf32>
    %17 = arith.maximumf %15, %16 : vector<14x128xf32>
    %c0_17 = arith.constant 0 : index
    %c0_18 = arith.constant 0 : index
    %18 = vector.load %arg10[%c0_17, %c0_18] : memref<16x128xf32, #tpu.memory_space<vmem>>, vector<14x128xf32>
    tpu.vector_store %arg10[%c0_17, %c0_18], %17 {strides = array<i32>} : memref<16x128xf32, #tpu.memory_space<vmem>>, vector<14x128xf32>,
    %c0_19 = arith.constant 0 : index
    %c0_20 = arith.constant 0 : index
    %19 = tpu.strided_load %arg10[%c0_19, %c0_20] {strides = array<i32: 3, 1>} : memref<16x128xf32, #tpu.memory_space<vmem>>, vector<4x128xf32>
    %c1 = arith.constant 1 : index
    %c0_21 = arith.constant 0 : index
    %20 = tpu.strided_load %arg10[%c1, %c0_21] {strides = array<i32: 3, 1>} : memref<16x128xf32, #tpu.memory_space<vmem>>, vector<4x128xf32>
    %c2 = arith.constant 2 : index
    %c0_22 = arith.constant 0 : index
    %21 = tpu.strided_load %arg10[%c2, %c0_22] {strides = array<i32: 3, 1>} : memref<16x128xf32, #tpu.memory_space<vmem>>, vector<4x128xf32>
    %c3 = arith.constant 3 : index
    %c0_23 = arith.constant 0 : index
    %22 = tpu.strided_load %arg10[%c3, %c0_23] {strides = array<i32: 3, 1>} : memref<16x128xf32, #tpu.memory_space<vmem>>, vector<4x128xf32>
    %c4 = arith.constant 4 : index
    %c0_24 = arith.constant 0 : index
    %23 = tpu.strided_load %arg10[%c4, %c0_24] {strides = array<i32: 3, 1>} : memref<16x128xf32, #tpu.memory_space<vmem>>, vector<4x128xf32>
    %24 = tpu.concatenate %19, %20, %21, %22, %23 in 1 : vector<4x128xf32>, vector<4x128xf32>, vector<4x128xf32>, vector<4x128xf32>, vector<4x128xf32> -> vector<4x640xf32>
    %25 = arith.truncf %24 : vector<4x640xf32> to vector<4x640xbf16>
    %cst_25 = arith.constant dense<0.000000e+00> : vector<4x128xf32>
    %26 = tpu.matmul %25, %2, %cst_25 {dimension_numbers = #tpu.dot_dimension_numbers<[1], [0], [0], [1], [0, 0, 1, 1], [], []>} : vector<4x640xbf16>, vector<640x128xbf16>, vector<4x128xf32> -> vector<4x128xf32>
    %27 = vector.broadcast %3 : vector<1x128xf32> to vector<4x128xf32>
    %28 = arith.addf %26, %27 : vector<4x128xf32>
    %cst_26 = arith.constant 0.000000e+00 : f32
    %29 = vector.broadcast %cst_26 : f32 to vector<4x128xf32>
    %30 = arith.maximumf %28, %29 : vector<4x128xf32>
    %31 = arith.truncf %30 : vector<4x128xf32> to vector<4x128xbf16>
    %cst_27 = arith.constant dense<0.000000e+00> : vector<4x128xf32>
    %32 = tpu.matmul %31, %4, %cst_27 {dimension_numbers = #tpu.dot_dimension_numbers<[1], [0], [0], [1], [0, 0, 1, 1], [], []>} : vector<4x128xbf16>, vector<128x128xbf16>, vector<4x128xf32> -> vector<4x128xf32>
    %33 = vector.broadcast %5 : vector<1x128xf32> to vector<4x128xf32>
    %34 = arith.addf %32, %33 : vector<4x128xf32>
    %cst_28 = arith.constant 4.000000e+00 : f32
    %35 = vector.broadcast %cst_28 : f32 to vector<4x128xf32>
    %36 = arith.mulf %34, %35 : vector<4x128xf32>
    %37 = arith.addf %36, %6 : vector<4x128xf32>
    %c0_29 = arith.constant 0 : index
    %c0_30 = arith.constant 0 : index
    %c0_31 = arith.constant 0 : index
    %38 = vector.load %arg9[%c0_29, %c0_30, %c0_31] : memref<1x4x128xf32, #tpu.memory_space<vmem>>, vector<1x4x128xf32>
    %39 = vector.shape_cast %38 : vector<1x4x128xf32> to vector<4x128xf32>
    %40 = vector.shape_cast %37 : vector<4x128xf32> to vector<1x4x128xf32>
    tpu.vector_store %arg9[%c0_29, %c0_30, %c0_31], %40 {strides = array<i32>} : memref<1x4x128xf32, #tpu.memory_space<vmem>>, vector<1x4x128xf32>,
    return
  }
  func.func @transform_0(%arg0: i32) -> (i32, i32, i32) {
    %c0_i32 = arith.constant 0 : i32
    %c0_i32_0 = arith.constant 0 : i32
    %c0_i32_1 = arith.constant 0 : i32
    return %arg0, %c0_i32, %c0_i32_0 : i32, i32, i32
  }
  func.func @transform_1(%arg0: i32) -> (i32, i32) {
    %c0_i32 = arith.constant 0 : i32
    %c0_i32_0 = arith.constant 0 : i32
    %c0_i32_1 = arith.constant 0 : i32
    return %c0_i32, %c0_i32_0 : i32, i32
  }
  func.func @transform_2(%arg0: i32) -> (i32, i32) {
    %c0_i32 = arith.constant 0 : i32
    %c0_i32_0 = arith.constant 0 : i32
    %c0_i32_1 = arith.constant 0 : i32
    return %c0_i32, %c0_i32_0 : i32, i32
  }
  func.func @transform_3(%arg0: i32) -> (i32, i32) {
    %c0_i32 = arith.constant 0 : i32
    %c0_i32_0 = arith.constant 0 : i32
    %c0_i32_1 = arith.constant 0 : i32
    return %c0_i32, %c0_i32_0 : i32, i32
  }
  func.func @transform_4(%arg0: i32) -> (i32, i32) {
    %c0_i32 = arith.constant 0 : i32
    %c0_i32_0 = arith.constant 0 : i32
    %c0_i32_1 = arith.constant 0 : i32
    return %c0_i32, %c0_i32_0 : i32, i32
  }
  func.func @transform_5(%arg0: i32) -> (i32, i32) {
    %c0_i32 = arith.constant 0 : i32
    %c0_i32_0 = arith.constant 0 : i32
    %c0_i32_1 = arith.constant 0 : i32
    return %c0_i32, %c0_i32_0 : i32, i32
  }
  func.func @transform_6(%arg0: i32) -> (i32, i32) {
    %c0_i32 = arith.constant 0 : i32
    %c0_i32_0 = arith.constant 0 : i32
    %c0_i32_1 = arith.constant 0 : i32
    return %c0_i32, %c0_i32_0 : i32, i32
  }
  func.func @transform_7(%arg0: i32) -> (i32, i32) {
    %c0_i32 = arith.constant 0 : i32
    %c0_i32_0 = arith.constant 0 : i32
    %c0_i32_1 = arith.constant 0 : i32
    return %c0_i32, %c0_i32_0 : i32, i32
  }
  func.func @transform_8(%arg0: i32) -> (i32, i32, i32) {
    %c0_i32 = arith.constant 0 : i32
    %c0_i32_0 = arith.constant 0 : i32
    %c0_i32_1 = arith.constant 0 : i32
    return %arg0, %c0_i32, %c0_i32_0 : i32, i32, i32
  }
}

</mosaic_0001>

<bundles_post_ra>
// kernel: tpu_custom_call.1
= control target key start
LH: loop header
LB: loop body
LE: loop exit
PB: predicated region body
PF: predicated region fallthrough
CT: control target
= control target key end

     0   :  { %s2208_s0 = inlined_call_operand.hbm [shape: bf16[2,16,128], index: 0, kind: input, shape index: {}]   ;;  %s2209_s1 = inlined_call_operand.hbm [shape: bf16[384,128], index: 1, kind: input, shape index: {}]   ;;  %s2210_s2 = inlined_call_operand.vmem [shape: f32[1,128], index: 2, kind: input, shape index: {}]   ;;  %s2211_s3 = inlined_call_operand.hbm [shape: bf16[640,128], index: 3, kind: input, shape index: {}]   ;;  %s2212_s4 = inlined_call_operand.vmem [shape: f32[1,128], index: 4, kind: input, shape index: {}]   ;;  %s2213_s5 = inlined_call_operand.hbm [shape: bf16[128,128], index: 5, kind: input, shape index: {}]   ;;  %s2214_s6 = inlined_call_operand.hbm [shape: f32[1,128], index: 6, kind: input, shape index: {}]   ;;  %s2215_s7 = inlined_call_operand.vmem [shape: f32[4,128], index: 7, kind: input, shape index: {}]   ;;  %s2216_s8 = inlined_call_operand.hbm [shape: f32[2,4,128], index: 8, kind: output, shape index: {}]  }
   0x1   :  { %2219 = sst [smem:[#allocation17_spill]] %s2209_s1 }
   0x2   :  { %2220 = sst [smem:[#allocation18_spill]] %s2211_s3 }
   0x3   :  { %13 = vsyncpa [#allocation4], 0 }
   0x4   :  { %15 = vsyncpa [#allocation4 + $0x1], 0 }
   0x5   :  { %16 = vsyncpa [#allocation7], 0 }
   0x6   :  { %17 = vsyncpa [#allocation10], 0 }
   0x7   :  { %18 = vsyncpa [#allocation5], 0 }
   0x8   :  { %20 = vsyncpa [#allocation5 + $0x1], 0  ;;  %s2020_s27 = smov 0   ;;  %s2022_s28 = smov 0  }
   0x9   :  { %s2024_s29 = smov 0   ;;  %s2026_s30 = smov 0  }
   0xa LB: > { %s2041_s9 = sadd.s32 4294967295, %s1967_s30   ;;  %s1264_s10 = sadd.s32 4294967294, %s1967_s30   ;;  %s1967_s30 = sphi %s2026_s30, %s2235_s30   ;;  %s1963_s29 = sphi %s2024_s29, %s2234_s29   ;;  %s1959_s28 = sphi %s2022_s28, %s2233_s28   ;;  %s1955_s27 = sphi %s2020_s27, %s2232_s27  }
   0xb   : > { %p46_p0 = scmp.ne.s32.totalorder %s1959_s28, %s1955_s27  ;;  %p47_p1 = scmp.eq.s32.totalorder %s2041_s9, 0 }
   0xc   : > { %p217_p2 = scmp.eq.s32.totalorder %s2041_s9, 1  ;;  %p223_p3 = scmp.eq.s32.totalorder %s1264_s10, 1 }
   0xd   : > { %p2050_p4 = por %p47_p1, %p46_p0  ;;  %p1265_p5 = scmp.ge.s32.totalorder %s1967_s30, 1 }
   0xe   : > { %p2055_p6 = por %p223_p3, %p46_p0  ;;  %p230_p7 = scmp.lt.s32.totalorder %s1967_s30, 3 }
   0xf   : > { %s2223_s1 = sld [smem:[#allocation17_spill]]  ;;  %s1969_s17 = smov [#allocation6]  }
  0x10   : > { %p2063_p8 = pnand %p1265_p5, %p230_p7  ;;  %s243_s18 = sshll.u32 %s1969_s17, 4  ;;  %s244_s18 = int_to_ptr.vmem [resolvable:$true] %s243_s18 }
  0x11   : > { %s275_s22 = sshll.u32 %s2213_s5, 4  ;;  %s2217_s23 = smov 64   ;;  %s276_s22 = int_to_ptr.hbm [resolvable:$true] %s275_s22 }
  0x12   : > { %p1671_p9 = pneg %p2063_p8  ;;  %s2218_s24 = smov 4  }
  0x13   : > { %s1972_s25 = smov [#allocation9]   ;;  %s2226_s3 = sld [smem:[#allocation18_spill]] }
  0x14   : > { %p2071_p10 = pnand %p1671_p9, %p47_p1  ;;  %s277_s26 = sshll.u32 %s1972_s25, 4  ;;  %s278_s26 = int_to_ptr.vmem [resolvable:$true] %s277_s26 }
  0x15   : > { %s241_s15 = sshll.u32 %s2223_s1, 4  ;;  %s1973_s20 = smov [#allocation8]   ;;  %s242_s15 = int_to_ptr.hbm [resolvable:$true] %s241_s15 }
  0x16   : > { %1674 = dma.hbm_to_vmem [thread:$0]  (!%p2071_p10), %s242_s15, 3072, %s244_s18, [#allocation7], %s2217_s23, %s2217_s23, %s2218_s24  }
  0x17   : > { %1680 = dma.hbm_to_vmem [thread:$0]  (!%p2071_p10), %s276_s22, 1024, %s278_s26, [#allocation10], %s2217_s23, %s2217_s23, %s2218_s24  }
  0x18   : > { %s290_s18 = sshll.u32 %s2214_s6, 4  ;;  %s260_s21 = sshll.u32 %s1973_s20, 4  ;;  %s291_s18 = int_to_ptr.hbm [resolvable:$true] %s290_s18  ;;  %s261_s21 = int_to_ptr.vmem [resolvable:$true] %s260_s21 }
  0x19   : > { %s258_s14 = sshll.u32 %s2226_s3, 4  ;;  %s1974_s25 = smov [#allocation11]   ;;  %s259_s14 = int_to_ptr.hbm [resolvable:$true] %s258_s14 }
  0x1a   : > { %1677 = dma.hbm_to_vmem [thread:$0]  (!%p2071_p10), %s259_s14, 5120, %s261_s21, [#allocation7], %s2217_s23, %s2217_s23, %s2218_s24  }
  0x1b   : > { %s292_s22 = sshll.u32 %s1974_s25, 4  ;;  %s2103_s26 = sadd.s32 1, %s1967_s30   ;;  %s293_s22 = int_to_ptr.vmem [resolvable:$true] %s292_s22 }
  0x1c   : > { %1683 = dma.hbm_to_vmem [thread:$0]  (!%p2071_p10), %s291_s18, 16, %s293_s22, [#allocation10]  }
  0x1d   : > { %s33_s10 = sadd.s32 1, %s1963_s29  ;;  %s30_s13 = ssub.s32 %s1967_s30, %s2103_s26 }
  0x1e   : > { %p40_p12 = scmp.ne.s32.totalorder %s1963_s29, %s1959_s28  ;;  %p31_p13 = scmp.eq.s32.totalorder %s30_s13, 0 }
  0x1f   : > { %p41_p0 = scmp.eq.s32.totalorder %s1967_s30, 0  ;;  %p1696_p5 = scmp.lt.s32.totalorder %s1967_s30, 2 }
  0x20   : > { %p2113_p3 = por %p217_p2, %p40_p12  ;;  %s306_s17 = sand.u32 1, %s1963_s29  }
  0x21   : > { %s2119_s14 = scalar_select %p31_p13, %s1963_s29, %s33_s10  }
  0x22   : > { %p42_p7 = por %p41_p0, %p40_p12  ;;  %s1271_s19 = sshll.u32 %s306_s17, 3 }
  0x23   : > { %s1577_s18 = sshll.u32 %s1967_s30, 3  ;;  %s310_s22 = scalar_lea.vmem [#allocation3], %s1271_s19 }
  0x24   : > { %s315_s25 = scalar_lea.hbm %s2208_s0, %s1577_s18  ;;  %s318_s23 = sshll.u32 %s310_s22, 4  ;;  %s319_s23 = int_to_ptr.vmem [resolvable:$true] %s318_s23 }
  0x25   : > { %s316_s13 = sshll.u32 %s315_s25, 4  ;;  %p2126_p2 = pnand %p1696_p5, %p42_p7  ;;  %s317_s13 = int_to_ptr.hbm [resolvable:$true] %s316_s13 }
  0x26   : > { %s307_s10 = scalar_lea.sflag [#allocation4], %s306_s17  ;;  %s1863_s1 = sshra.s32 %s317_s13, 4  ;;  %s1864_s1 = int_to_ptr.hbm [resolvable:$true] %s1863_s1 }
  0x27   : > { %s1865_s3 = scalar_lea.hbm %s1864_s1, 8  ;;  %p1867_p10 = pneg %p2126_p2 }
  0x28   : > { %p1866_p9 = scmp.ne.s32.totalorder %s1864_s1, %s1865_s3  ;;  %s1870_s20 = scalar_lea.hbm %s2208_s0, 16 }
  0x29   : > { %p1871_p0 = scmp.lt.s32.totalorder %s1864_s1, %s2208_s0  ;;  %p1872_p5 = scmp.lt.s32.totalorder %s1870_s20, %s1865_s3 }
  0x2a   : > { %p1868_p12 = pnand %p1867_p10, %p1866_p9 }
  0x2b   : > { %p1873_p7 = por %p1872_p5, %p1871_p0 }
  0x2c   : > { %p1869_p13 = pneg %p1868_p12 }
  0x2e   : > { %p1874_p11 = pnand %p1873_p7, %p1869_p13 }
  0x30   : > { %1877 = shalt.err (!%p1874_p11)
}
  0x31   : > { %s2229_s17 = smov 4   ;;  %s2230_s22 = smov 64  }
  0x32   : > { %1687 = dma.hbm_to_vmem [thread:$0]  (!%p2126_p2), %s317_s13, 128, %s319_s23, %s307_s10, %s2230_s22, %s2230_s22, %s2229_s17  }
  0x33   : > { %330 = sbr.rel (%p2063_p8) target bundleno = 539 (0x21b), region = 52  ;;  %s2146_s18 = sand.u32 (!%p2063_p8), 1, %s1959_s28  }
  0x34   : > { %s1275_s1 = sshll.u32 (!%p2063_p8), %s2146_s18, 3  ;;  %s333_s3 = scalar_lea.sflag (!%p2063_p8), [#allocation4], %s2146_s18 }
  0x35   : > { %s2150_s19 = scalar_lea.vmem (!%p2063_p8), [#allocation3], %s1275_s1 }
  0x38   : > { %1938 = dma.done.wait (%p2050_p4), %s333_s3, 128  }
  0x39   : > { %1940 = vsyncadd (%p2050_p4), %s333_s3, 4294967168 }
  0x3a   : > { %1942 = dma.done.wait (%p47_p1), [#allocation7], 8192  }
  0x3b   : > { %1944 = vsyncadd (%p47_p1), [#allocation7], 4294959104 }
  0x3c   : > { %1946 = dma.done.wait (%p47_p1), [#allocation10], 1040  }
  0x3d   : > { %1948 = vsyncadd (%p47_p1), [#allocation10], 4294966256  ;;  %v1585_v0 = vld [vmem:[#allocation6 + $0x38] sm:$0xff]  ;;  %v1584_v3 = vld [vmem:[#allocation6 + $0x30] sm:$0xff]  ;;  %s1280_s13 = sshll.u32 %s2146_s18, 2  ;;  %s1574_s10 = sshll.u32 %s2041_s9, 2 }
  0x3e   : > { %v1593_v1 = vld [vmem:[#allocation6 + $0x78] sm:$0xff]  ;;  %703 = vmatpush.bf16.msra.mxu0 %v1585_v0  ;;  %v1592_v4 = vld [vmem:[#allocation6 + $0x70] sm:$0xff]  ;;  %v1583_v6 = vld [vmem:[#allocation6 + $0x28] sm:$0xff]  ;;  %s1151_s25 = scalar_lea.hbm %s2216_s8, %s1574_s10  ;;  %s389_s1 = scalar_lea.vmem [#allocation12], %s1280_s13 }
  0x3f   : > { %v1601_v2 = vld [vmem:[#allocation6 + $0xb8] sm:$0xff]  ;;  %717 = vmatpush.bf16.msra.mxu1 %v1593_v1  ;;  %v1600_v5 = vld [vmem:[#allocation6 + $0xb0] sm:$0xff]  ;;  %v1591_v7 = vld [vmem:[#allocation6 + $0x68] sm:$0xff]  ;;  %s1153_s3 = sshll.u32 %s389_s1, 4  ;;  %s1141_s9 = scalar_lea.sflag [#allocation5], %s2146_s18  ;;  %s1154_s3 = int_to_ptr.vmem [resolvable:$true] %s1153_s3 }
  0x40   : > { %731 = vmatpush.bf16.msra.mxu2 %v1601_v2  ;;  %v1599_v8 = vld [vmem:[#allocation6 + $0xa8] sm:$0xff]  ;;  %v1609_v9 = vld [vmem:[#allocation8 + $0x38] sm:$0xff]  ;;  %v1582_v10 = vld [vmem:[#allocation6 + $0x20] sm:$0xff]  ;;  %s1913_s13 = scalar_lea.hbm %s2216_s8, 8 }
  0x41   : > { %v1590_v11 = vld [vmem:[#allocation6 + $0x60] sm:$0xff]  ;;  %1006 = vmatpush.bf16.msra.mxu3 %v1609_v9  ;;  %v1608_v13 = vld [vmem:[#allocation8 + $0x30] sm:$0xff]  ;;  %v1581_v14 = vld [vmem:[#allocation6 + $0x18] sm:$0xff] }
  0x42   : > { %704 = vmatpush.bf16.msra.mxu0 %v1584_v3  ;;  %v1598_v12 = vld [vmem:[#allocation6 + $0xa0] sm:$0xff]  ;;  %v1589_v15 = vld [vmem:[#allocation6 + $0x58] sm:$0xff]  ;;  %v1607_v17 = vld [vmem:[#allocation8 + $0x28] sm:$0xff] }
  0x43   : > { %718 = vmatpush.bf16.msra.mxu1 %v1592_v4  ;;  %v1597_v16 = vld [vmem:[#allocation6 + $0x98] sm:$0xff]  ;;  %v1580_v19 = vld [vmem:[#allocation6 + $0x10] sm:$0xff]  ;;  %v1606_v22 = vld [vmem:[#allocation8 + $0x20] sm:$0xff] }
  0x44   : > { %732 = vmatpush.bf16.msra.mxu2 %v1600_v5  ;;  %v1650_v18 = vld [vmem:[%s2150_s19] sm:$0xff]  ;;  %v1579_v24 = vld [vmem:[#allocation6 + $0x8] sm:$0xff]  ;;  %v1578_v29 = vld [vmem:[#allocation6] sm:$0xff]  ;;  %s1155_s19 = sshll.u32 %s1151_s25, 4  ;;  %s1156_s19 = int_to_ptr.hbm [resolvable:$true] %s1155_s19 }
  0x45   : > { %1007 = vmatpush.bf16.msra.mxu3 %v1608_v13  ;;  %v1588_v20 = vld [vmem:[#allocation6 + $0x50] sm:$0xff]  ;;  %v549_v23 = vshll.u32 %v1650_v18, 16  ;;  %v1587_v25 = vld [vmem:[#allocation6 + $0x48] sm:$0xff]  ;;  %v547_v27 = vshrl.u32 %v1650_v18, 16  ;;  %v1586_v30 = vld [vmem:[#allocation6 + $0x40] sm:$0xff]  ;;  %v554_v36 = vrot.slane %v1650_v18, 1 }
  0x46   : > { %705 = vmatpush.bf16.msra.mxu0 %v1583_v6  ;;  %v1596_v21 = vld [vmem:[#allocation6 + $0x90] sm:$0xff]  ;;  %v1595_v26 = vld [vmem:[#allocation6 + $0x88] sm:$0xff]  ;;  %v1594_v31 = vld [vmem:[#allocation6 + $0x80] sm:$0xff]  ;;  %s1907_s11 = sshra.s32 %s1156_s19, 4  ;;  %s1908_s11 = int_to_ptr.hbm [resolvable:$true] %s1907_s11 }
  0x47   : > { %719 = vmatpush.bf16.msra.mxu1 %v1591_v7  ;;  %v551_v28 = vrot.slane %v549_v23, 1  ;;  %v1617_v32 = vld [vmem:[#allocation8 + $0x78] sm:$0xff]  ;;  %v1616_v38 = vld [vmem:[#allocation8 + $0x70] sm:$0xff]  ;;  %v1615_v42 = vld [vmem:[#allocation8 + $0x68] sm:$0xff]  ;;  %s1909_s16 = scalar_lea.hbm %s1908_s11, 4  ;;  %p1914_p11 = scmp.lt.s32.totalorder %s1908_s11, %s2216_s8 }
  0x48   : > { %733 = vmatpush.bf16.msra.mxu2 %v1599_v8  ;;  %v1625_v33 = vld [vmem:[#allocation8 + $0xb8] sm:$0xff]  ;;  %v1624_v39 = vld [vmem:[#allocation8 + $0xb0] sm:$0xff]  ;;  %v1623_v43 = vld [vmem:[#allocation8 + $0xa8] sm:$0xff]  ;;  %p1910_p1 = scmp.ne.s32.totalorder %s1908_s11, %s1909_s16  ;;  %p1915_p2 = scmp.lt.s32.totalorder %s1913_s13, %s1909_s16 }
  0x49   : > { %1008 = vmatpush.bf16.msra.mxu3 %v1607_v17  ;;  %v1633_v34 = vld [vmem:[#allocation8 + $0xf8] sm:$0xff]  ;;  %v552_v35 = vor.u32 %v551_v28, %v547_v27  ;;  %v1632_v40 = vld [vmem:[#allocation8 + $0xf0] sm:$0xff]  ;;  %v1631_v44 = vld [vmem:[#allocation8 + $0xe8] sm:$0xff] }
  0x4a   : > { %706 = vmatpush.bf16.msra.mxu0 %v1582_v10  ;;  %v1605_v37 = vld [vmem:[#allocation8 + $0x18] sm:$0xff]  ;;  %v1604_v41 = vld [vmem:[#allocation8 + $0x10] sm:$0xff]  ;;  %v1603_v45 = vld [vmem:[#allocation8 + $0x8] sm:$0xff]  ;;  %p1911_p4 = pnand %p1910_p1, %p2113_p3  ;;  %p1916_p9 = por %p1915_p2, %p1914_p11 }
  0x4b   : > { %720 = vmatpush.bf16.msra.mxu1 %v1590_v11  ;;  %v1614_v46 = vld [vmem:[#allocation8 + $0x60] sm:$0xff]  ;;  %v1613_v50 = vld [vmem:[#allocation8 + $0x58] sm:$0xff]  ;;  %v1612_v54 = vld [vmem:[#allocation8 + $0x50] sm:$0xff] }
  0x4c   : > { %734 = vmatpush.bf16.msra.mxu2 %v1598_v12  ;;  %v1622_v47 = vld [vmem:[#allocation8 + $0xa0] sm:$0xff]  ;;  %v1621_v51 = vld [vmem:[#allocation8 + $0x98] sm:$0xff]  ;;  %v1620_v55 = vld [vmem:[#allocation8 + $0x90] sm:$0xff]  ;;  %p1912_p8 = pneg %p1911_p4 }
  0x4d   : > { %1009 = vmatpush.bf16.msra.mxu3 %v1606_v22  ;;  %v1630_v48 = vld [vmem:[#allocation8 + $0xe0] sm:$0xff]  ;;  %v1629_v52 = vld [vmem:[#allocation8 + $0xd8] sm:$0xff]  ;;  %v1628_v56 = vld [vmem:[#allocation8 + $0xd0] sm:$0xff] }
  0x4e   : > { %707 = vmatpush.bf16.msra.mxu0 %v1581_v14  ;;  %v1602_v49 = vld [vmem:[#allocation8] sm:$0xff]  ;;  %v1641_v53 = vld [vmem:[#allocation8 + $0x138] sm:$0xff]  ;;  %v1640_v57 = vld [vmem:[#allocation8 + $0x130] sm:$0xff]  ;;  %p1917_p10 = pnand %p1916_p9, %p1912_p8 }
  0x4f   : > { %721 = vmatpush.bf16.msra.mxu1 %v1589_v15  ;;  %v1611_v58 = vld [vmem:[#allocation8 + $0x48] sm:$0xff]  ;;  %v1610_v62 = vld [vmem:[#allocation8 + $0x40] sm:$0xff]  ;;  %v1637_v3 = vld [vmem:[#allocation8 + $0x118] sm:$0xff] }
  0x50   : > { %735 = vmatpush.bf16.msra.mxu2 %v1597_v16  ;;  %v1619_v59 = vld [vmem:[#allocation8 + $0x88] sm:$0xff]  ;;  %v1618_v63 = vld [vmem:[#allocation8 + $0x80] sm:$0xff]  ;;  %v1636_v5 = vld [vmem:[#allocation8 + $0x110] sm:$0xff] }
  0x51   : > { %1010 = vmatpush.bf16.msra.mxu3 %v1605_v37  ;;  %v1627_v60 = vld [vmem:[#allocation8 + $0xc8] sm:$0xff]  ;;  %v1626_v0 = vld [vmem:[#allocation8 + $0xc0] sm:$0xff] }
  0x52   : > { %708 = vmatpush.bf16.msra.mxu0 %v1580_v19  ;;  %v1639_v61 = vld [vmem:[#allocation8 + $0x128] sm:$0xff]  ;;  %v1638_v1 = vld [vmem:[#allocation8 + $0x120] sm:$0xff] }
  0x53   : > { %722 = vmatpush.bf16.msra.mxu1 %v1588_v20  ;;  %v1740_v2 = vld [vmem:[%s2210_s2] ss:$0 sm:$0xff]  ;;  %v1635_v9 = vld [vmem:[#allocation8 + $0x108] sm:$0xff] }
  0x54   : > { %736 = vmatpush.bf16.msra.mxu2 %v1596_v21  ;;  %v1634_v13 = vld [vmem:[#allocation8 + $0x100] sm:$0xff]  ;;  %v1643_v37 = vld [vmem:[#allocation9 + $0x8] sm:$0xff] }
  0x55   : > { %1011 = vmatpush.bf16.msra.mxu3 %v1604_v41  ;;  %v1741_v41 = vld [vmem:[%s2212_s4] ss:$0 sm:$0xff] }
  0x56   : > { %709 = vmatpush.bf16.msra.mxu0 %v1579_v24 }
  0x57   : > { %723 = vmatpush.bf16.msra.mxu1 %v1587_v25 }
  0x58   : > { %737 = vmatpush.bf16.msra.mxu2 %v1595_v26 }
  0x59   : > { %1012 = vmatpush.bf16.msra.mxu3 %v1603_v45 }
  0x5a   : > { %710 = vmatpush.bf16.msra.mxu0 %v1578_v29 }
  0x5b   : > { %724 = vmatpush.bf16.msra.mxu1 %v1586_v30 }
  0x5c   : > { %738 = vmatpush.bf16.msra.mxu2 %v1594_v31 }
  0x5d   : > { %711 = vmatmul.bf16.vlgmr.msra.gmra.mxu0 %v1650_v18  ;;  %1013 = vmatpush.bf16.msra.mxu3 %v1602_v49  ;;  %v1649_v18 = vld [vmem:[#allocation9 + $0x38] sm:$0xff] }
  0x5e   : > { %1019 = vmatpush.bf16.msrb.mxu0 %v1617_v32  ;;  %725 = vmatmul.bf16.vlgmr.msra.gmra.mxu1 %v552_v35  ;;  %v1648_v32 = vld [vmem:[#allocation9 + $0x30] sm:$0xff]  ;;  %v1645_v35 = vld [vmem:[#allocation9 + $0x18] sm:$0xff] }
  0x5f   : > { %1032 = vmatpush.bf16.msrb.mxu1 %v1625_v33  ;;  %739 = vmatmul.bf16.vlgmr.msra.gmra.mxu2 %v554_v36  ;;  %v1647_v33 = vld [vmem:[#allocation9 + $0x28] sm:$0xff]  ;;  %v1644_v36 = vld [vmem:[#allocation9 + $0x10] sm:$0xff] }
  0x60   : > { %1045 = vmatpush.bf16.msrb.mxu2 %v1633_v34  ;;  %v1646_v34 = vld [vmem:[#allocation9 + $0x20] sm:$0xff] }
  0x61   : > { %1058 = vmatpush.bf16.msrb.mxu3 %v1641_v53 }
  0x62   : > { %1020 = vmatpush.bf16.msrb.mxu0 %v1616_v38  ;;  %v1642_v38 = vld [vmem:[#allocation9] sm:$0xff] }
  0x63   : > { %1033 = vmatpush.bf16.msrb.mxu1 %v1624_v39 }
  0x64   : > { %1046 = vmatpush.bf16.msrb.mxu2 %v1632_v40 }
  0x65   : > { %1059 = vmatpush.bf16.msrb.mxu3 %v1640_v57  ;;  %v1742_v57 = vld [vmem:[#allocation11] ss:$0 sm:$0xff] }
  0x66   : > { %1021 = vmatpush.bf16.msrb.mxu0 %v1615_v42 }
  0x67   : > { %1034 = vmatpush.bf16.msrb.mxu1 %v1623_v43 }
  0x68   : > { %1047 = vmatpush.bf16.msrb.mxu2 %v1631_v44 }
  0x69   : > { %1060 = vmatpush.bf16.msrb.mxu3 %v1639_v61 }
  0x6a   : > { %1022 = vmatpush.bf16.msrb.mxu0 %v1614_v46 }
  0x6b   : > { %1035 = vmatpush.bf16.msrb.mxu1 %v1622_v47 }
  0x6c   : > { %1048 = vmatpush.bf16.msrb.mxu2 %v1630_v48 }
  0x6d   : > { %1061 = vmatpush.bf16.msrb.mxu3 %v1638_v1 }
  0x6e   : > { %1023 = vmatpush.bf16.msrb.mxu0 %v1613_v50 }
  0x6f   : > { %1036 = vmatpush.bf16.msrb.mxu1 %v1621_v51 }
  0x70   : > { %1049 = vmatpush.bf16.msrb.mxu2 %v1629_v52 }
  0x71   : > { %1062 = vmatpush.bf16.msrb.mxu3 %v1637_v3 }
  0x72   : > { %1024 = vmatpush.bf16.msrb.mxu0 %v1612_v54 }
  0x73   : > { %1037 = vmatpush.bf16.msrb.mxu1 %v1620_v55 }
  0x74   : > { %1050 = vmatpush.bf16.msrb.mxu2 %v1628_v56 }
  0x75   : > { %1063 = vmatpush.bf16.msrb.mxu3 %v1636_v5 }
  0x76   : > { %1025 = vmatpush.bf16.msrb.mxu0 %v1611_v58 }
  0x77   : > { %1038 = vmatpush.bf16.msrb.mxu1 %v1619_v59 }
  0x78   : > { %1051 = vmatpush.bf16.msrb.mxu2 %v1627_v60  ;;  %v537_v60 = vld [vmem:[%s2215_s7] sm:$0xf] }
  0x79   : > { %1064 = vmatpush.bf16.msrb.mxu3 %v1635_v9 }
  0x7a   : > { %1026 = vmatpush.bf16.msrb.mxu0 %v1610_v62 }
  0x7b   : > { %1039 = vmatpush.bf16.msrb.mxu1 %v1618_v63 }
  0x7c   : > { %1052 = vmatpush.bf16.msrb.mxu2 %v1626_v0 }
  0x7d   : > { %1065 = vmatpush.bf16.msrb.mxu3 %v1634_v13 }
  0x7e   : > { %1124 = vmatpush.bf16.msra.mxu0 %v1649_v18 }
  0x82   : > { %1125 = vmatpush.bf16.msra.mxu0 %v1648_v32 }
  0x86   : > { %1126 = vmatpush.bf16.msra.mxu0 %v1647_v33 }
  0x8a   : > { %1127 = vmatpush.bf16.msra.mxu0 %v1646_v34 }
  0x8e   : > { %1128 = vmatpush.bf16.msra.mxu0 %v1645_v35 }
  0x92   : > { %1129 = vmatpush.bf16.msra.mxu0 %v1644_v36 }
  0x96   : > { %1130 = vmatpush.bf16.msra.mxu0 %v1643_v37 }
  0x9a   : > { %1131 = vmatpush.bf16.msra.mxu0 %v1642_v38 }
  0xda   : > { %v712_v4 = vpop.f32.mrf.mxu0 }
  0xdb   : > { %v713_v6 = vadd.f32 %v1740_v2, %v712_v4  ;;  %v726_v7 = vpop.f32.mrf.mxu1 }
  0xdd   : > { %v727_v8 = vadd.f32 %v726_v7, %v713_v6 }
  0xe2   : > { %v740_v10 = vpop.f32.mrf.mxu2  ;;  %v714_v12 = vpop.f32.mrf.mxu0 }
  0xe3   : > { %v741_v11 = vadd.f32 %v740_v10, %v727_v8  ;;  %v715_v15 = vadd.f32 %v1740_v2, %v714_v12  ;;  %v728_v16 = vpop.f32.mrf.mxu1 }
  0xe5   : > { %v745_v14 = vmax.f32 %v741_v11, 0.0  ;;  %v729_v17 = vadd.f32 %v728_v16, %v715_v15 }
  0xe7   : > { %747 = vst [vmem:[#allocation2] sm:$0xff] %v745_v14 }
  0xea   : > { %v742_v19 = vpop.f32.mrf.mxu2 }
  0xeb   : > { %v743_v20 = vadd.f32 %v742_v19, %v729_v17 }
  0xed   : > { %v746_v21 = vmax.f32 %v743_v20, 0.0 }
  0xef   : > { %748 = vst [vmem:[#allocation2 + $0x8] sm:$0x3f] %v746_v21 }
  0xf6   : > { %v749_v22 = vld [vmem:[#allocation2] ss:$3 sm:$0xf]  ;;  %v751_v23 = vld [vmem:[#allocation2 + $0x1] ss:$3 sm:$0xf] }
  0xf7   : > { %v758_v24 = vpack.c.bf16 %v749_v22, %v749_v22  ;;  %v759_v25 = vpack.c.bf16 %v751_v23, %v751_v23  ;;  %v753_v26 = vld [vmem:[#allocation2 + $0x2] ss:$3 sm:$0xf]  ;;  %v755_v27 = vld [vmem:[#allocation2 + $0x3] ss:$3 sm:$0xf] }
  0xf8   : > { %v760_v28 = vpack.c.bf16 %v753_v26, %v753_v26  ;;  %v761_v29 = vpack.c.bf16 %v755_v27, %v755_v27  ;;  %v757_v30 = vld [vmem:[#allocation2 + $0x4] ss:$3 sm:$0xf] }
  0xf9   : > { %1014 = vmatmul.bf16.vlgmr.msra.gmra.mxu3 %v758_v24  ;;  %1027 = vmatmul.bf16.vlgmr.msrb.gmra.mxu0 %v759_v25  ;;  %v762_v31 = vpack.c.bf16 %v757_v30, %v757_v30 }
  0xfa   : > { %1040 = vmatmul.bf16.vlgmr.msrb.gmra.mxu1 %v760_v28  ;;  %1053 = vmatmul.bf16.vlgmr.msrb.gmra.mxu2 %v761_v29 }
 0x109   : > { %1066 = vmatmul.bf16.vlgmr.msrb.gmra.mxu3 %v762_v31 }
 0x176   : > { %v1028_v39 = vpop.f32.mrf.mxu0 }
 0x177   : > { %v1041_v40 = vpop.f32.mrf.mxu1 }
 0x17c   : > { %v1015_v42 = vpop.f32.mrf.mxu3 }
 0x17d   : > { %v1054_v43 = vpop.f32.mrf.mxu2  ;;  %v1016_v45 = vadd.f32 %v1741_v41, %v1015_v42 }
 0x17e   : > { %v1030_v44 = vpop.f32.mrf.mxu0 }
 0x17f   : > { %v1043_v46 = vpop.f32.mrf.mxu1  ;;  %v1029_v47 = vadd.f32 %v1028_v39, %v1016_v45 }
 0x181   : > { %v1042_v50 = vadd.f32 %v1041_v40, %v1029_v47 }
 0x183   : > { %v1055_v51 = vadd.f32 %v1054_v43, %v1042_v50 }
 0x184   : > { %v1017_v48 = vpop.f32.mrf.mxu3 }
 0x185   : > { %v1056_v49 = vpop.f32.mrf.mxu2 }
 0x18c   : > { %v1067_v52 = vpop.f32.mrf.mxu3 }
 0x18d   : > { %v1068_v53 = vadd.f32 %v1067_v52, %v1055_v51 }
 0x18f   : > { %v1071_v54 = vmax.f32 %v1068_v53, 0.0 }
 0x191   : > { %v1072_v55 = vpack.c.bf16 %v1071_v54, %v1071_v54 }
 0x193   : > { %1132 = vmatmul.bf16.vlgmr.msra.gmra.mxu0 %v1072_v55 }
 0x194   : > { %v1069_v56 = vpop.f32.mrf.mxu3 }
 0x210   : > { %v1133_v58 = vpop.f32.mrf.mxu0 }
 0x211   : > { %v1134_v59 = vadd.f32 %v1742_v57, %v1133_v58 }
 0x213   : > { %v1137_v61 = vmul.f32 4.0, %v1134_v59 }
 0x215   : > { %v1138_v62 = vadd.f32 %v1137_v61, %v537_v60 }
 0x217   : > { %1139 = vst [vmem:[%s389_s1] sm:$0xf] %v1138_v62 }
 0x218   : > { %v1135_v63 = vpop.f32.mrf.mxu0 }
 0x219   : > { %1920 = shalt.err (!%p1917_p10)
}
 0x21a   : > { %1669 = dma.vmem_to_hbm [thread:$0]  (%p2113_p3), %s1154_s3, 64, %s1156_s19, %s1141_s9  }
 0x21b PF: > { %s1167_s18 = sand.u32 1, %s1955_s27   ;;  %p2231_p12 = scmp.ge.s32.totalorder %s1967_s30, 2 }
 0x21c   : > { %s1168_s21 = scalar_lea.sflag [#allocation5], %s1167_s18 }
 0x21d   : > { %p1689_p13 = pnand %p2231_p12, %p2055_p6 }
 0x21f   : > { %p1690_p0 = pneg %p1689_p13 }
 0x221   : > { %1950 = dma.done.wait (%p1690_p0), %s1168_s21, 64  }
 0x222   : > { %1952 = vsyncadd (%p1690_p0), %s1168_s21, 4294967232  ;;  %p23_p5 = scmp.ge.s32.totalorder %s2103_s26, 4   ;;  %s2232_s27 = smov %s1959_s28 }
 0x223   : > { %s2233_s28 = smov %s1963_s29  ;;  %s2234_s29 = smov %s2119_s14 }
 0x224   : > { %s2235_s30 = smov %s2103_s26  ;;  %25 = sbr.rel (!%p23_p5) target bundleno = 10 (0xa), region = 117 }
 0x229   :  { %1174 = vsyncpa [#allocation4], 1 }
 0x22a   :  { %1176 = vsyncpa [#allocation4 + $0x1], 1 }
 0x22b   :  { %1177 = vsyncpa [#allocation7], 1 }
 0x22c   :  { %1178 = vsyncpa [#allocation10], 1 }
 0x22d   :  { %1179 = vsyncpa [#allocation5], 1 }
 0x22e   :  { %1181 = vsyncpa [#allocation5 + $0x1], 1 }

</bundles_post_ra>
